<compile_context>
chip_gen: v5e
topology: v5e:2x2
jax: 0.10.0
libtpu: 0.0.40
codegen_flags: <defaults>
</compile_context>

<pallas_src>
import functools
import numpy as np
import jax
import jax.numpy as jnp
from jax import lax
from jax.experimental import pallas as pl
from jax.experimental.pallas import tpu as pltpu

# ----------------------------- sizes -----------------------------------------
B = 8      # batch_size
N = 8      # num_boxes
F = 128    # image feature_size
E = 128    # token embedding size
H = 128    # hidden size
V = 128    # vocab size
L = 9      # max caption length  -> max_step = L - 1
MAX_STEP = L - 1
TB = MAX_STEP * B


# ----------------------------- kernel ----------------------------------------
def _captioner_kernel(tok_ref, gt_ref, img_ref,
                      m_ref, whh_ref, wvh_ref, bh_ref, who_ref, bo_ref,
                      loss_ref, *maybe_logits):
    logits_ref = maybe_logits[0] if maybe_logits else None
    f32, bf16 = jnp.float32, jnp.bfloat16

    # ---- loop-invariant work, computed once ----------------------------------
    ctx = jnp.mean(img_ref[...], axis=1)                                  # (B, F) f32
    base = (jnp.dot(ctx.astype(bf16), wvh_ref[...],
                    preferred_element_type=f32) + bh_ref[...])            # (B, H) f32

    # ---- embedding path, folded & batched over all steps ---------------------
    # x_all[t*B + b] = onehot(token_{t,b}) @ (emb @ Wxh)   (one (T*B,V)@(V,H) matmul)
    tok_iota = lax.broadcasted_iota(jnp.int32, (TB, V), 1)
    tok_oh = jnp.where(tok_iota == tok_ref[...], 1.0, 0.0).astype(bf16)   # (T*B, V)
    x_all = jnp.dot(tok_oh, m_ref[...], preferred_element_type=f32)       # (T*B, H)

    gt_iota = lax.broadcasted_iota(jnp.int32, (B, V), 1)

    whh = whh_ref[...]
    who = who_ref[...]
    bo = bo_ref[...]

    # ---- serial recurrence: only h@Whh and h@Who on the critical path --------
    h = jnp.zeros((B, H), f32)
    loss_acc = jnp.zeros((B, 1), f32)
    for t in range(MAX_STEP):          # static trip count -> fully unrolled
        pre = (jnp.dot(h.astype(bf16), whh, preferred_element_type=f32)
               + x_all[t * B:(t + 1) * B, :] + base)
        h = jnp.tanh(pre)
        logits = jnp.dot(h.astype(bf16), who, preferred_element_type=f32) + bo
        if logits_ref is not None:
            logits_ref[t] = logits

        # fused cross-entropy: lse - gathered ground-truth logit
        mx = jnp.max(logits, axis=-1, keepdims=True)
        lse = mx + jnp.log(jnp.sum(jnp.exp(logits - mx), axis=-1, keepdims=True))
        gt_mask = gt_iota == gt_ref[t * B:(t + 1) * B, :]
        gt_logit = jnp.sum(jnp.where(gt_mask, logits, 0.0), axis=-1, keepdims=True)
        loss_acc = loss_acc + (lse - gt_logit)

    loss_ref[0, 0] = jnp.sum(loss_acc) / jnp.float32(TB)


# ----------------------------- param preparation -------------------------------
def _prepare_params(params):
    """Fold emb @ Wxh and cast matmul weights to bf16 (f32 accumulation in-kernel)."""
    f32, bf16 = jnp.float32, jnp.bfloat16
    return {
        "m":   (params["emb"].astype(f32) @ params["wxh"].astype(f32)).astype(bf16),
        "whh": params["whh"].astype(bf16),
        "wvh": params["wvh"].astype(bf16),
        "who": params["who"].astype(bf16),
        "bh":  params["bh"].astype(f32),
        "bo":  params["bo"].astype(f32),
    }


# ----------------------------- wrapper ----------------------------------------
@functools.partial(jax.jit, static_argnames=("return_logits",))
def captioner_forward(image_features, targets, params, return_logits=False):
    """Training forward: returns {'loss': scalar}.
    With return_logits=True also returns time-major per-step logits (T, B, V)."""
    kp = _prepare_params(params)
    targets_t = targets.T.astype(jnp.int32)            # (L, B) time-major
    tok_ids = targets_t[:-1].reshape(TB, 1)            # input tokens, (T*B, 1)
    gt_ids = targets_t[1:].reshape(TB, 1)              # ground-truth, (T*B, 1)

    vmem = pl.BlockSpec(memory_space=pltpu.MemorySpace.VMEM)
    smem = pl.BlockSpec(memory_space=pltpu.MemorySpace.SMEM)

    out_shape = [jax.ShapeDtypeStruct((1, 1), jnp.float32)]
    out_specs = [smem]
    if return_logits:
        out_shape.append(jax.ShapeDtypeStruct((MAX_STEP, B, V), jnp.float32))
        out_specs.append(vmem)

    outs = pl.pallas_call(
        _captioner_kernel,
        out_shape=tuple(out_shape),
        in_specs=[vmem] * 9,
        out_specs=tuple(out_specs),
    )(tok_ids, gt_ids, image_features.astype(jnp.float32),
      kp["m"], kp["whh"], kp["wvh"], kp["bh"], kp["who"], kp["bo"])

    output = {"loss": outs[0][0, 0]}
    if return_logits:
        return output, outs[1]
    return output


# ----------------------------- pure-JAX reference ------------------------------
def captioner_reference(image_features, targets, params):
    """Mirrors the kernel's numerics (folded embedding, bf16 matmul operands,
    f32 accumulation) so it can be compared at tight tolerances."""
    f32, bf16 = jnp.float32, jnp.bfloat16
    kp = _prepare_params(params)
    targets_t = targets.T.astype(jnp.int32)
    tok_seq, gt_seq = targets_t[:-1], targets_t[1:]

    ctx = jnp.mean(image_features.astype(f32), axis=1)
    base = jnp.dot(ctx.astype(bf16), kp["wvh"], preferred_element_type=f32) + kp["bh"]

    h = jnp.zeros((B, H), f32)
    losses, logits_all = [], []
    for t in range(MAX_STEP):
        x = kp["m"][tok_seq[t]].astype(f32)            # == onehot @ (emb @ Wxh)
        pre = jnp.dot(h.astype(bf16), kp["whh"], preferred_element_type=f32) + x + base
        h = jnp.tanh(pre)
        logits = jnp.dot(h.astype(bf16), kp["who"], preferred_element_type=f32) + kp["bo"]
        logits_all.append(logits)
        logp = jax.nn.log_softmax(logits, axis=-1)
        losses.append(-logp[jnp.arange(B), gt_seq[t]])
    loss = jnp.mean(jnp.stack(losses))
    return loss, jnp.stack(logits_all)


# ----------------------------- main --------------------------------------------
if __name__ == "__main__":
    key = jax.random.PRNGKey(0)
    k_img, k_tgt, k1, k2, k3, k4, k5, k6, k7 = jax.random.split(key, 9)

    image_features = jax.random.normal(k_img, (B, N, F), jnp.float32)
    targets = jax.random.randint(k_tgt, (B, L), 0, V, jnp.int32)

    s = 0.05
    params = {
        "emb": jax.random.normal(k1, (V, E), jnp.float32) * s,
        "wxh": jax.random.normal(k2, (E, H), jnp.float32) * s,
        "whh": jax.random.normal(k3, (H, H), jnp.float32) * s,
        "wvh": jax.random.normal(k4, (F, H), jnp.float32) * s,
        "bh":  jax.random.normal(k5, (1, H), jnp.float32) * s,
        "who": jax.random.normal(k6, (H, V), jnp.float32) * s,
        "bo":  jax.random.normal(k7, (1, V), jnp.float32) * s,
    }

    # default (fast) path: loss only
    out = captioner_forward(image_features, targets, params)
    jax.block_until_ready(out["loss"])

    # verification path: also emit per-step logits
    out_v, logits_seq = captioner_forward(image_features, targets, params,
                                          return_logits=True)
    jax.block_until_ready(logits_seq)

    ref_loss, ref_logits = captioner_reference(image_features, targets, params)
    np.testing.assert_allclose(np.asarray(out["loss"]), np.asarray(ref_loss),
                               rtol=1e-3, atol=1e-3)
    np.testing.assert_allclose(np.asarray(out_v["loss"]), np.asarray(ref_loss),
                               rtol=1e-3, atol=1e-3)
    np.testing.assert_allclose(np.asarray(logits_seq), np.asarray(ref_logits),
                               rtol=1e-2, atol=1e-2)

    print("KERNEL_OK")
</pallas_src>

<mosaic_0001>
module attributes {stable_mosaic.version = 11 : i64} {
  func.func @_captioner_kernel(%arg0: memref<64x1xi32, #tpu.memory_space<vmem>>, %arg1: memref<64x1xi32, #tpu.memory_space<vmem>>, %arg2: memref<8x8x128xf32, #tpu.memory_space<vmem>>, %arg3: memref<128x128xbf16, #tpu.memory_space<vmem>>, %arg4: memref<128x128xbf16, #tpu.memory_space<vmem>>, %arg5: memref<128x128xbf16, #tpu.memory_space<vmem>>, %arg6: memref<1x128xf32, #tpu.memory_space<vmem>>, %arg7: memref<128x128xbf16, #tpu.memory_space<vmem>>, %arg8: memref<1x128xf32, #tpu.memory_space<vmem>>, %arg9: memref<1x1xf32, #tpu.memory_space<smem>>) attributes {dimension_semantics = [], scalar_prefetch = 0 : i64, scratch_operands = 0 : i64, tpu.core_type = #tpu.core_type<tc>} {
    %c0 = arith.constant 0 : index
    %c0_0 = arith.constant 0 : index
    %c0_1 = arith.constant 0 : index
    %0 = vector.load %arg2[%c0, %c0_0, %c0_1] : memref<8x8x128xf32, #tpu.memory_space<vmem>>, vector<8x8x128xf32>
    %cst = arith.constant dense<0.000000e+00> : vector<8x128xf32>
    %1 = vector.multi_reduction <add>, %0, %cst [1] : vector<8x8x128xf32> to vector<8x128xf32>
    %cst_2 = arith.constant 8.000000e+00 : f32
    %2 = vector.broadcast %cst_2 : f32 to vector<8x128xf32>
    %3 = arith.divf %1, %2 : vector<8x128xf32>
    %4 = arith.truncf %3 : vector<8x128xf32> to vector<8x128xbf16>
    %c0_3 = arith.constant 0 : index
    %c0_4 = arith.constant 0 : index
    %5 = vector.load %arg5[%c0_3, %c0_4] : memref<128x128xbf16, #tpu.memory_space<vmem>>, vector<128x128xbf16>
    %cst_5 = arith.constant dense<0.000000e+00> : vector<8x128xf32>
    %6 = tpu.matmul %4, %5, %cst_5 {dimension_numbers = #tpu.dot_dimension_numbers<[1], [0], [0], [1], [0, 0, 1, 1], [], []>} : vector<8x128xbf16>, vector<128x128xbf16>, vector<8x128xf32> -> vector<8x128xf32>
    %c0_6 = arith.constant 0 : index
    %c0_7 = arith.constant 0 : index
    %7 = vector.load %arg6[%c0_6, %c0_7] : memref<1x128xf32, #tpu.memory_space<vmem>>, vector<1x128xf32>
    %8 = vector.broadcast %7 : vector<1x128xf32> to vector<8x128xf32>
    %9 = arith.addf %6, %8 : vector<8x128xf32>
    %10 = tpu.iota {dimensions = array<i32: 1>} : vector<64x128xi32>
    %c0_8 = arith.constant 0 : index
    %c0_9 = arith.constant 0 : index
    %11 = vector.load %arg0[%c0_8, %c0_9] : memref<64x1xi32, #tpu.memory_space<vmem>>, vector<64x1xi32>
    %12 = vector.broadcast %11 : vector<64x1xi32> to vector<64x128xi32>
    %13 = arith.cmpi eq, %10, %12 : vector<64x128xi32>
    %cst_10 = arith.constant 1.000000e+00 : f32
    %cst_11 = arith.constant 0.000000e+00 : f32
    %14 = vector.broadcast %cst_10 : f32 to vector<64x128xf32>
    %15 = vector.broadcast %cst_11 : f32 to vector<64x128xf32>
    %16 = arith.select %13, %14, %15 : vector<64x128xi1>, vector<64x128xf32>
    %17 = arith.truncf %16 : vector<64x128xf32> to vector<64x128xbf16>
    %c0_12 = arith.constant 0 : index
    %c0_13 = arith.constant 0 : index
    %18 = vector.load %arg3[%c0_12, %c0_13] : memref<128x128xbf16, #tpu.memory_space<vmem>>, vector<128x128xbf16>
    %cst_14 = arith.constant dense<0.000000e+00> : vector<64x128xf32>
    %19 = tpu.matmul %17, %18, %cst_14 {dimension_numbers = #tpu.dot_dimension_numbers<[1], [0], [0], [1], [0, 0, 1, 1], [], []>} : vector<64x128xbf16>, vector<128x128xbf16>, vector<64x128xf32> -> vector<64x128xf32>
    %20 = tpu.iota {dimensions = array<i32: 1>} : vector<8x128xi32>
    %c0_15 = arith.constant 0 : index
    %c0_16 = arith.constant 0 : index
    %21 = vector.load %arg4[%c0_15, %c0_16] : memref<128x128xbf16, #tpu.memory_space<vmem>>, vector<128x128xbf16>
    %c0_17 = arith.constant 0 : index
    %c0_18 = arith.constant 0 : index
    %22 = vector.load %arg7[%c0_17, %c0_18] : memref<128x128xbf16, #tpu.memory_space<vmem>>, vector<128x128xbf16>
    %c0_19 = arith.constant 0 : index
    %c0_20 = arith.constant 0 : index
    %23 = vector.load %arg8[%c0_19, %c0_20] : memref<1x128xf32, #tpu.memory_space<vmem>>, vector<1x128xf32>
    %cst_21 = arith.constant 0.000000e+00 : f32
    %24 = vector.broadcast %cst_21 : f32 to vector<8x128xf32>
    %cst_22 = arith.constant 0.000000e+00 : f32
    %25 = vector.broadcast %cst_22 : f32 to vector<8x1xf32>
    %26 = arith.truncf %24 : vector<8x128xf32> to vector<8x128xbf16>
    %cst_23 = arith.constant dense<0.000000e+00> : vector<8x128xf32>
    %27 = tpu.matmul %26, %21, %cst_23 {dimension_numbers = #tpu.dot_dimension_numbers<[1], [0], [0], [1], [0, 0, 1, 1], [], []>} : vector<8x128xbf16>, vector<128x128xbf16>, vector<8x128xf32> -> vector<8x128xf32>
    %28 = vector.extract_strided_slice %19 {offsets = [0, 0], sizes = [8, 128], strides = [1, 1]} : vector<64x128xf32> to vector<8x128xf32>
    %29 = arith.addf %27, %28 : vector<8x128xf32>
    %30 = arith.addf %29, %9 : vector<8x128xf32>
    %31 = math.tanh %30 : vector<8x128xf32>
    %32 = arith.truncf %31 : vector<8x128xf32> to vector<8x128xbf16>
    %cst_24 = arith.constant dense<0.000000e+00> : vector<8x128xf32>
    %33 = tpu.matmul %32, %22, %cst_24 {dimension_numbers = #tpu.dot_dimension_numbers<[1], [0], [0], [1], [0, 0, 1, 1], [], []>} : vector<8x128xbf16>, vector<128x128xbf16>, vector<8x128xf32> -> vector<8x128xf32>
    %34 = vector.broadcast %23 : vector<1x128xf32> to vector<8x128xf32>
    %35 = arith.addf %33, %34 : vector<8x128xf32>
    %cst_25 = arith.constant dense<0xFF800000> : vector<8xf32>
    %36 = vector.multi_reduction <maximumf>, %35, %cst_25 [1] : vector<8x128xf32> to vector<8xf32>
    %37 = vector.shape_cast %36 : vector<8xf32> to vector<8x1xf32>
    %38 = vector.broadcast %37 : vector<8x1xf32> to vector<8x128xf32>
    %39 = arith.subf %35, %38 : vector<8x128xf32>
    %40 = math.exp %39 : vector<8x128xf32>
    %cst_26 = arith.constant dense<0.000000e+00> : vector<8xf32>
    %41 = vector.multi_reduction <add>, %40, %cst_26 [1] : vector<8x128xf32> to vector<8xf32>
    %42 = vector.shape_cast %41 : vector<8xf32> to vector<8x1xf32>
    %43 = math.log %42 : vector<8x1xf32>
    %44 = arith.addf %37, %43 : vector<8x1xf32>
    %c0_27 = arith.constant 0 : index
    %c0_28 = arith.constant 0 : index
    %45 = vector.load %arg1[%c0_27, %c0_28] : memref<64x1xi32, #tpu.memory_space<vmem>>, vector<8x1xi32>
    %46 = vector.broadcast %45 : vector<8x1xi32> to vector<8x128xi32>
    %47 = arith.cmpi eq, %20, %46 : vector<8x128xi32>
    %cst_29 = arith.constant 0.000000e+00 : f32
    %48 = vector.broadcast %cst_29 : f32 to vector<8x128xf32>
    %49 = arith.select %47, %35, %48 : vector<8x128xi1>, vector<8x128xf32>
    %cst_30 = arith.constant dense<0.000000e+00> : vector<8xf32>
    %50 = vector.multi_reduction <add>, %49, %cst_30 [1] : vector<8x128xf32> to vector<8xf32>
    %51 = vector.shape_cast %50 : vector<8xf32> to vector<8x1xf32>
    %52 = arith.subf %44, %51 : vector<8x1xf32>
    %53 = arith.addf %25, %52 : vector<8x1xf32>
    %54 = arith.truncf %31 : vector<8x128xf32> to vector<8x128xbf16>
    %cst_31 = arith.constant dense<0.000000e+00> : vector<8x128xf32>
    %55 = tpu.matmul %54, %21, %cst_31 {dimension_numbers = #tpu.dot_dimension_numbers<[1], [0], [0], [1], [0, 0, 1, 1], [], []>} : vector<8x128xbf16>, vector<128x128xbf16>, vector<8x128xf32> -> vector<8x128xf32>
    %56 = vector.extract_strided_slice %19 {offsets = [8, 0], sizes = [8, 128], strides = [1, 1]} : vector<64x128xf32> to vector<8x128xf32>
    %57 = arith.addf %55, %56 : vector<8x128xf32>
    %58 = arith.addf %57, %9 : vector<8x128xf32>
    %59 = math.tanh %58 : vector<8x128xf32>
    %60 = arith.truncf %59 : vector<8x128xf32> to vector<8x128xbf16>
    %cst_32 = arith.constant dense<0.000000e+00> : vector<8x128xf32>
    %61 = tpu.matmul %60, %22, %cst_32 {dimension_numbers = #tpu.dot_dimension_numbers<[1], [0], [0], [1], [0, 0, 1, 1], [], []>} : vector<8x128xbf16>, vector<128x128xbf16>, vector<8x128xf32> -> vector<8x128xf32>
    %62 = vector.broadcast %23 : vector<1x128xf32> to vector<8x128xf32>
    %63 = arith.addf %61, %62 : vector<8x128xf32>
    %cst_33 = arith.constant dense<0xFF800000> : vector<8xf32>
    %64 = vector.multi_reduction <maximumf>, %63, %cst_33 [1] : vector<8x128xf32> to vector<8xf32>
    %65 = vector.shape_cast %64 : vector<8xf32> to vector<8x1xf32>
    %66 = vector.broadcast %65 : vector<8x1xf32> to vector<8x128xf32>
    %67 = arith.subf %63, %66 : vector<8x128xf32>
    %68 = math.exp %67 : vector<8x128xf32>
    %cst_34 = arith.constant dense<0.000000e+00> : vector<8xf32>
    %69 = vector.multi_reduction <add>, %68, %cst_34 [1] : vector<8x128xf32> to vector<8xf32>
    %70 = vector.shape_cast %69 : vector<8xf32> to vector<8x1xf32>
    %71 = math.log %70 : vector<8x1xf32>
    %72 = arith.addf %65, %71 : vector<8x1xf32>
    %c8 = arith.constant 8 : index
    %c0_35 = arith.constant 0 : index
    %73 = vector.load %arg1[%c8, %c0_35] : memref<64x1xi32, #tpu.memory_space<vmem>>, vector<8x1xi32>
    %74 = vector.broadcast %73 : vector<8x1xi32> to vector<8x128xi32>
    %75 = arith.cmpi eq, %20, %74 : vector<8x128xi32>
    %cst_36 = arith.constant 0.000000e+00 : f32
    %76 = vector.broadcast %cst_36 : f32 to vector<8x128xf32>
    %77 = arith.select %75, %63, %76 : vector<8x128xi1>, vector<8x128xf32>
    %cst_37 = arith.constant dense<0.000000e+00> : vector<8xf32>
    %78 = vector.multi_reduction <add>, %77, %cst_37 [1] : vector<8x128xf32> to vector<8xf32>
    %79 = vector.shape_cast %78 : vector<8xf32> to vector<8x1xf32>
    %80 = arith.subf %72, %79 : vector<8x1xf32>
    %81 = arith.addf %53, %80 : vector<8x1xf32>
    %82 = arith.truncf %59 : vector<8x128xf32> to vector<8x128xbf16>
    %cst_38 = arith.constant dense<0.000000e+00> : vector<8x128xf32>
    %83 = tpu.matmul %82, %21, %cst_38 {dimension_numbers = #tpu.dot_dimension_numbers<[1], [0], [0], [1], [0, 0, 1, 1], [], []>} : vector<8x128xbf16>, vector<128x128xbf16>, vector<8x128xf32> -> vector<8x128xf32>
    %84 = vector.extract_strided_slice %19 {offsets = [16, 0], sizes = [8, 128], strides = [1, 1]} : vector<64x128xf32> to vector<8x128xf32>
    %85 = arith.addf %83, %84 : vector<8x128xf32>
    %86 = arith.addf %85, %9 : vector<8x128xf32>
    %87 = math.tanh %86 : vector<8x128xf32>
    %88 = arith.truncf %87 : vector<8x128xf32> to vector<8x128xbf16>
    %cst_39 = arith.constant dense<0.000000e+00> : vector<8x128xf32>
    %89 = tpu.matmul %88, %22, %cst_39 {dimension_numbers = #tpu.dot_dimension_numbers<[1], [0], [0], [1], [0, 0, 1, 1], [], []>} : vector<8x128xbf16>, vector<128x128xbf16>, vector<8x128xf32> -> vector<8x128xf32>
    %90 = vector.broadcast %23 : vector<1x128xf32> to vector<8x128xf32>
    %91 = arith.addf %89, %90 : vector<8x128xf32>
    %cst_40 = arith.constant dense<0xFF800000> : vector<8xf32>
    %92 = vector.multi_reduction <maximumf>, %91, %cst_40 [1] : vector<8x128xf32> to vector<8xf32>
    %93 = vector.shape_cast %92 : vector<8xf32> to vector<8x1xf32>
    %94 = vector.broadcast %93 : vector<8x1xf32> to vector<8x128xf32>
    %95 = arith.subf %91, %94 : vector<8x128xf32>
    %96 = math.exp %95 : vector<8x128xf32>
    %cst_41 = arith.constant dense<0.000000e+00> : vector<8xf32>
    %97 = vector.multi_reduction <add>, %96, %cst_41 [1] : vector<8x128xf32> to vector<8xf32>
    %98 = vector.shape_cast %97 : vector<8xf32> to vector<8x1xf32>
    %99 = math.log %98 : vector<8x1xf32>
    %100 = arith.addf %93, %99 : vector<8x1xf32>
    %c16 = arith.constant 16 : index
    %c0_42 = arith.constant 0 : index
    %101 = vector.load %arg1[%c16, %c0_42] : memref<64x1xi32, #tpu.memory_space<vmem>>, vector<8x1xi32>
    %102 = vector.broadcast %101 : vector<8x1xi32> to vector<8x128xi32>
    %103 = arith.cmpi eq, %20, %102 : vector<8x128xi32>
    %cst_43 = arith.constant 0.000000e+00 : f32
    %104 = vector.broadcast %cst_43 : f32 to vector<8x128xf32>
    %105 = arith.select %103, %91, %104 : vector<8x128xi1>, vector<8x128xf32>
    %cst_44 = arith.constant dense<0.000000e+00> : vector<8xf32>
    %106 = vector.multi_reduction <add>, %105, %cst_44 [1] : vector<8x128xf32> to vector<8xf32>
    %107 = vector.shape_cast %106 : vector<8xf32> to vector<8x1xf32>
    %108 = arith.subf %100, %107 : vector<8x1xf32>
    %109 = arith.addf %81, %108 : vector<8x1xf32>
    %110 = arith.truncf %87 : vector<8x128xf32> to vector<8x128xbf16>
    %cst_45 = arith.constant dense<0.000000e+00> : vector<8x128xf32>
    %111 = tpu.matmul %110, %21, %cst_45 {dimension_numbers = #tpu.dot_dimension_numbers<[1], [0], [0], [1], [0, 0, 1, 1], [], []>} : vector<8x128xbf16>, vector<128x128xbf16>, vector<8x128xf32> -> vector<8x128xf32>
    %112 = vector.extract_strided_slice %19 {offsets = [24, 0], sizes = [8, 128], strides = [1, 1]} : vector<64x128xf32> to vector<8x128xf32>
    %113 = arith.addf %111, %112 : vector<8x128xf32>
    %114 = arith.addf %113, %9 : vector<8x128xf32>
    %115 = math.tanh %114 : vector<8x128xf32>
    %116 = arith.truncf %115 : vector<8x128xf32> to vector<8x128xbf16>
    %cst_46 = arith.constant dense<0.000000e+00> : vector<8x128xf32>
    %117 = tpu.matmul %116, %22, %cst_46 {dimension_numbers = #tpu.dot_dimension_numbers<[1], [0], [0], [1], [0, 0, 1, 1], [], []>} : vector<8x128xbf16>, vector<128x128xbf16>, vector<8x128xf32> -> vector<8x128xf32>
    %118 = vector.broadcast %23 : vector<1x128xf32> to vector<8x128xf32>
    %119 = arith.addf %117, %118 : vector<8x128xf32>
    %cst_47 = arith.constant dense<0xFF800000> : vector<8xf32>
    %120 = vector.multi_reduction <maximumf>, %119, %cst_47 [1] : vector<8x128xf32> to vector<8xf32>
    %121 = vector.shape_cast %120 : vector<8xf32> to vector<8x1xf32>
    %122 = vector.broadcast %121 : vector<8x1xf32> to vector<8x128xf32>
    %123 = arith.subf %119, %122 : vector<8x128xf32>
    %124 = math.exp %123 : vector<8x128xf32>
    %cst_48 = arith.constant dense<0.000000e+00> : vector<8xf32>
    %125 = vector.multi_reduction <add>, %124, %cst_48 [1] : vector<8x128xf32> to vector<8xf32>
    %126 = vector.shape_cast %125 : vector<8xf32> to vector<8x1xf32>
    %127 = math.log %126 : vector<8x1xf32>
    %128 = arith.addf %121, %127 : vector<8x1xf32>
    %c24 = arith.constant 24 : index
    %c0_49 = arith.constant 0 : index
    %129 = vector.load %arg1[%c24, %c0_49] : memref<64x1xi32, #tpu.memory_space<vmem>>, vector<8x1xi32>
    %130 = vector.broadcast %129 : vector<8x1xi32> to vector<8x128xi32>
    %131 = arith.cmpi eq, %20, %130 : vector<8x128xi32>
    %cst_50 = arith.constant 0.000000e+00 : f32
    %132 = vector.broadcast %cst_50 : f32 to vector<8x128xf32>
    %133 = arith.select %131, %119, %132 : vector<8x128xi1>, vector<8x128xf32>
    %cst_51 = arith.constant dense<0.000000e+00> : vector<8xf32>
    %134 = vector.multi_reduction <add>, %133, %cst_51 [1] : vector<8x128xf32> to vector<8xf32>
    %135 = vector.shape_cast %134 : vector<8xf32> to vector<8x1xf32>
    %136 = arith.subf %128, %135 : vector<8x1xf32>
    %137 = arith.addf %109, %136 : vector<8x1xf32>
    %138 = arith.truncf %115 : vector<8x128xf32> to vector<8x128xbf16>
    %cst_52 = arith.constant dense<0.000000e+00> : vector<8x128xf32>
    %139 = tpu.matmul %138, %21, %cst_52 {dimension_numbers = #tpu.dot_dimension_numbers<[1], [0], [0], [1], [0, 0, 1, 1], [], []>} : vector<8x128xbf16>, vector<128x128xbf16>, vector<8x128xf32> -> vector<8x128xf32>
    %140 = vector.extract_strided_slice %19 {offsets = [32, 0], sizes = [8, 128], strides = [1, 1]} : vector<64x128xf32> to vector<8x128xf32>
    %141 = arith.addf %139, %140 : vector<8x128xf32>
    %142 = arith.addf %141, %9 : vector<8x128xf32>
    %143 = math.tanh %142 : vector<8x128xf32>
    %144 = arith.truncf %143 : vector<8x128xf32> to vector<8x128xbf16>
    %cst_53 = arith.constant dense<0.000000e+00> : vector<8x128xf32>
    %145 = tpu.matmul %144, %22, %cst_53 {dimension_numbers = #tpu.dot_dimension_numbers<[1], [0], [0], [1], [0, 0, 1, 1], [], []>} : vector<8x128xbf16>, vector<128x128xbf16>, vector<8x128xf32> -> vector<8x128xf32>
    %146 = vector.broadcast %23 : vector<1x128xf32> to vector<8x128xf32>
    %147 = arith.addf %145, %146 : vector<8x128xf32>
    %cst_54 = arith.constant dense<0xFF800000> : vector<8xf32>
    %148 = vector.multi_reduction <maximumf>, %147, %cst_54 [1] : vector<8x128xf32> to vector<8xf32>
    %149 = vector.shape_cast %148 : vector<8xf32> to vector<8x1xf32>
    %150 = vector.broadcast %149 : vector<8x1xf32> to vector<8x128xf32>
    %151 = arith.subf %147, %150 : vector<8x128xf32>
    %152 = math.exp %151 : vector<8x128xf32>
    %cst_55 = arith.constant dense<0.000000e+00> : vector<8xf32>
    %153 = vector.multi_reduction <add>, %152, %cst_55 [1] : vector<8x128xf32> to vector<8xf32>
    %154 = vector.shape_cast %153 : vector<8xf32> to vector<8x1xf32>
    %155 = math.log %154 : vector<8x1xf32>
    %156 = arith.addf %149, %155 : vector<8x1xf32>
    %c32 = arith.constant 32 : index
    %c0_56 = arith.constant 0 : index
    %157 = vector.load %arg1[%c32, %c0_56] : memref<64x1xi32, #tpu.memory_space<vmem>>, vector<8x1xi32>
    %158 = vector.broadcast %157 : vector<8x1xi32> to vector<8x128xi32>
    %159 = arith.cmpi eq, %20, %158 : vector<8x128xi32>
    %cst_57 = arith.constant 0.000000e+00 : f32
    %160 = vector.broadcast %cst_57 : f32 to vector<8x128xf32>
    %161 = arith.select %159, %147, %160 : vector<8x128xi1>, vector<8x128xf32>
    %cst_58 = arith.constant dense<0.000000e+00> : vector<8xf32>
    %162 = vector.multi_reduction <add>, %161, %cst_58 [1] : vector<8x128xf32> to vector<8xf32>
    %163 = vector.shape_cast %162 : vector<8xf32> to vector<8x1xf32>
    %164 = arith.subf %156, %163 : vector<8x1xf32>
    %165 = arith.addf %137, %164 : vector<8x1xf32>
    %166 = arith.truncf %143 : vector<8x128xf32> to vector<8x128xbf16>
    %cst_59 = arith.constant dense<0.000000e+00> : vector<8x128xf32>
    %167 = tpu.matmul %166, %21, %cst_59 {dimension_numbers = #tpu.dot_dimension_numbers<[1], [0], [0], [1], [0, 0, 1, 1], [], []>} : vector<8x128xbf16>, vector<128x128xbf16>, vector<8x128xf32> -> vector<8x128xf32>
    %168 = vector.extract_strided_slice %19 {offsets = [40, 0], sizes = [8, 128], strides = [1, 1]} : vector<64x128xf32> to vector<8x128xf32>
    %169 = arith.addf %167, %168 : vector<8x128xf32>
    %170 = arith.addf %169, %9 : vector<8x128xf32>
    %171 = math.tanh %170 : vector<8x128xf32>
    %172 = arith.truncf %171 : vector<8x128xf32> to vector<8x128xbf16>
    %cst_60 = arith.constant dense<0.000000e+00> : vector<8x128xf32>
    %173 = tpu.matmul %172, %22, %cst_60 {dimension_numbers = #tpu.dot_dimension_numbers<[1], [0], [0], [1], [0, 0, 1, 1], [], []>} : vector<8x128xbf16>, vector<128x128xbf16>, vector<8x128xf32> -> vector<8x128xf32>
    %174 = vector.broadcast %23 : vector<1x128xf32> to vector<8x128xf32>
    %175 = arith.addf %173, %174 : vector<8x128xf32>
    %cst_61 = arith.constant dense<0xFF800000> : vector<8xf32>
    %176 = vector.multi_reduction <maximumf>, %175, %cst_61 [1] : vector<8x128xf32> to vector<8xf32>
    %177 = vector.shape_cast %176 : vector<8xf32> to vector<8x1xf32>
    %178 = vector.broadcast %177 : vector<8x1xf32> to vector<8x128xf32>
    %179 = arith.subf %175, %178 : vector<8x128xf32>
    %180 = math.exp %179 : vector<8x128xf32>
    %cst_62 = arith.constant dense<0.000000e+00> : vector<8xf32>
    %181 = vector.multi_reduction <add>, %180, %cst_62 [1] : vector<8x128xf32> to vector<8xf32>
    %182 = vector.shape_cast %181 : vector<8xf32> to vector<8x1xf32>
    %183 = math.log %182 : vector<8x1xf32>
    %184 = arith.addf %177, %183 : vector<8x1xf32>
    %c40 = arith.constant 40 : index
    %c0_63 = arith.constant 0 : index
    %185 = vector.load %arg1[%c40, %c0_63] : memref<64x1xi32, #tpu.memory_space<vmem>>, vector<8x1xi32>
    %186 = vector.broadcast %185 : vector<8x1xi32> to vector<8x128xi32>
    %187 = arith.cmpi eq, %20, %186 : vector<8x128xi32>
    %cst_64 = arith.constant 0.000000e+00 : f32
    %188 = vector.broadcast %cst_64 : f32 to vector<8x128xf32>
    %189 = arith.select %187, %175, %188 : vector<8x128xi1>, vector<8x128xf32>
    %cst_65 = arith.constant dense<0.000000e+00> : vector<8xf32>
    %190 = vector.multi_reduction <add>, %189, %cst_65 [1] : vector<8x128xf32> to vector<8xf32>
    %191 = vector.shape_cast %190 : vector<8xf32> to vector<8x1xf32>
    %192 = arith.subf %184, %191 : vector<8x1xf32>
    %193 = arith.addf %165, %192 : vector<8x1xf32>
    %194 = arith.truncf %171 : vector<8x128xf32> to vector<8x128xbf16>
    %cst_66 = arith.constant dense<0.000000e+00> : vector<8x128xf32>
    %195 = tpu.matmul %194, %21, %cst_66 {dimension_numbers = #tpu.dot_dimension_numbers<[1], [0], [0], [1], [0, 0, 1, 1], [], []>} : vector<8x128xbf16>, vector<128x128xbf16>, vector<8x128xf32> -> vector<8x128xf32>
    %196 = vector.extract_strided_slice %19 {offsets = [48, 0], sizes = [8, 128], strides = [1, 1]} : vector<64x128xf32> to vector<8x128xf32>
    %197 = arith.addf %195, %196 : vector<8x128xf32>
    %198 = arith.addf %197, %9 : vector<8x128xf32>
    %199 = math.tanh %198 : vector<8x128xf32>
    %200 = arith.truncf %199 : vector<8x128xf32> to vector<8x128xbf16>
    %cst_67 = arith.constant dense<0.000000e+00> : vector<8x128xf32>
    %201 = tpu.matmul %200, %22, %cst_67 {dimension_numbers = #tpu.dot_dimension_numbers<[1], [0], [0], [1], [0, 0, 1, 1], [], []>} : vector<8x128xbf16>, vector<128x128xbf16>, vector<8x128xf32> -> vector<8x128xf32>
    %202 = vector.broadcast %23 : vector<1x128xf32> to vector<8x128xf32>
    %203 = arith.addf %201, %202 : vector<8x128xf32>
    %cst_68 = arith.constant dense<0xFF800000> : vector<8xf32>
    %204 = vector.multi_reduction <maximumf>, %203, %cst_68 [1] : vector<8x128xf32> to vector<8xf32>
    %205 = vector.shape_cast %204 : vector<8xf32> to vector<8x1xf32>
    %206 = vector.broadcast %205 : vector<8x1xf32> to vector<8x128xf32>
    %207 = arith.subf %203, %206 : vector<8x128xf32>
    %208 = math.exp %207 : vector<8x128xf32>
    %cst_69 = arith.constant dense<0.000000e+00> : vector<8xf32>
    %209 = vector.multi_reduction <add>, %208, %cst_69 [1] : vector<8x128xf32> to vector<8xf32>
    %210 = vector.shape_cast %209 : vector<8xf32> to vector<8x1xf32>
    %211 = math.log %210 : vector<8x1xf32>
    %212 = arith.addf %205, %211 : vector<8x1xf32>
    %c48 = arith.constant 48 : index
    %c0_70 = arith.constant 0 : index
    %213 = vector.load %arg1[%c48, %c0_70] : memref<64x1xi32, #tpu.memory_space<vmem>>, vector<8x1xi32>
    %214 = vector.broadcast %213 : vector<8x1xi32> to vector<8x128xi32>
    %215 = arith.cmpi eq, %20, %214 : vector<8x128xi32>
    %cst_71 = arith.constant 0.000000e+00 : f32
    %216 = vector.broadcast %cst_71 : f32 to vector<8x128xf32>
    %217 = arith.select %215, %203, %216 : vector<8x128xi1>, vector<8x128xf32>
    %cst_72 = arith.constant dense<0.000000e+00> : vector<8xf32>
    %218 = vector.multi_reduction <add>, %217, %cst_72 [1] : vector<8x128xf32> to vector<8xf32>
    %219 = vector.shape_cast %218 : vector<8xf32> to vector<8x1xf32>
    %220 = arith.subf %212, %219 : vector<8x1xf32>
    %221 = arith.addf %193, %220 : vector<8x1xf32>
    %222 = arith.truncf %199 : vector<8x128xf32> to vector<8x128xbf16>
    %cst_73 = arith.constant dense<0.000000e+00> : vector<8x128xf32>
    %223 = tpu.matmul %222, %21, %cst_73 {dimension_numbers = #tpu.dot_dimension_numbers<[1], [0], [0], [1], [0, 0, 1, 1], [], []>} : vector<8x128xbf16>, vector<128x128xbf16>, vector<8x128xf32> -> vector<8x128xf32>
    %224 = vector.extract_strided_slice %19 {offsets = [56, 0], sizes = [8, 128], strides = [1, 1]} : vector<64x128xf32> to vector<8x128xf32>
    %225 = arith.addf %223, %224 : vector<8x128xf32>
    %226 = arith.addf %225, %9 : vector<8x128xf32>
    %227 = math.tanh %226 : vector<8x128xf32>
    %228 = arith.truncf %227 : vector<8x128xf32> to vector<8x128xbf16>
    %cst_74 = arith.constant dense<0.000000e+00> : vector<8x128xf32>
    %229 = tpu.matmul %228, %22, %cst_74 {dimension_numbers = #tpu.dot_dimension_numbers<[1], [0], [0], [1], [0, 0, 1, 1], [], []>} : vector<8x128xbf16>, vector<128x128xbf16>, vector<8x128xf32> -> vector<8x128xf32>
    %230 = vector.broadcast %23 : vector<1x128xf32> to vector<8x128xf32>
    %231 = arith.addf %229, %230 : vector<8x128xf32>
    %cst_75 = arith.constant dense<0xFF800000> : vector<8xf32>
    %232 = vector.multi_reduction <maximumf>, %231, %cst_75 [1] : vector<8x128xf32> to vector<8xf32>
    %233 = vector.shape_cast %232 : vector<8xf32> to vector<8x1xf32>
    %234 = vector.broadcast %233 : vector<8x1xf32> to vector<8x128xf32>
    %235 = arith.subf %231, %234 : vector<8x128xf32>
    %236 = math.exp %235 : vector<8x128xf32>
    %cst_76 = arith.constant dense<0.000000e+00> : vector<8xf32>
    %237 = vector.multi_reduction <add>, %236, %cst_76 [1] : vector<8x128xf32> to vector<8xf32>
    %238 = vector.shape_cast %237 : vector<8xf32> to vector<8x1xf32>
    %239 = math.log %238 : vector<8x1xf32>
    %240 = arith.addf %233, %239 : vector<8x1xf32>
    %c56 = arith.constant 56 : index
    %c0_77 = arith.constant 0 : index
    %241 = vector.load %arg1[%c56, %c0_77] : memref<64x1xi32, #tpu.memory_space<vmem>>, vector<8x1xi32>
    %242 = vector.broadcast %241 : vector<8x1xi32> to vector<8x128xi32>
    %243 = arith.cmpi eq, %20, %242 : vector<8x128xi32>
    %cst_78 = arith.constant 0.000000e+00 : f32
    %244 = vector.broadcast %cst_78 : f32 to vector<8x128xf32>
    %245 = arith.select %243, %231, %244 : vector<8x128xi1>, vector<8x128xf32>
    %cst_79 = arith.constant dense<0.000000e+00> : vector<8xf32>
    %246 = vector.multi_reduction <add>, %245, %cst_79 [1] : vector<8x128xf32> to vector<8xf32>
    %247 = vector.shape_cast %246 : vector<8xf32> to vector<8x1xf32>
    %248 = arith.subf %240, %247 : vector<8x1xf32>
    %249 = arith.addf %221, %248 : vector<8x1xf32>
    %250 = vector.shape_cast %249 : vector<8x1xf32> to vector<1x8x1xf32>
    %cst_80 = arith.constant dense<0.000000e+00> : vector<1xf32>
    %251 = vector.multi_reduction <add>, %250, %cst_80 [1, 2] : vector<1x8x1xf32> to vector<1xf32>
    %252 = vector.shape_cast %251 : vector<1xf32> to vector<1x1x1xf32>
    %253 = vector.extract %252[0, 0, 0] : f32 from vector<1x1x1xf32>
    %cst_81 = arith.constant 6.400000e+01 : f32
    %254 = arith.divf %253, %cst_81 : f32
    %c0_82 = arith.constant 0 : index
    %c0_83 = arith.constant 0 : index
    %255 = memref.load %arg9[%c0_82, %c0_83] : memref<1x1xf32, #tpu.memory_space<smem>>
    memref.store %254, %arg9[%c0_82, %c0_83] : memref<1x1xf32, #tpu.memory_space<smem>>
    return
  }
}

</mosaic_0001>

<bundles_post_ra>
// kernel: captioner_forward.1
= control target key start
LH: loop header
LB: loop body
LE: loop exit
PB: predicated region body
PF: predicated region fallthrough
CT: control target
= control target key end

     0   :  { %v1182_v2 = vmov 0   ;;  %s1684_s0 = inlined_call_operand.vmem [shape: s32[64,1], index: 0, kind: input, shape index: {}]   ;;  %s1685_s1 = inlined_call_operand.vmem [shape: s32[64,1], index: 1, kind: input, shape index: {}]   ;;  %s1686_s2 = inlined_call_operand.vmem [shape: f32[8,8,128], index: 2, kind: input, shape index: {}]   ;;  %s1687_s3 = inlined_call_operand.vmem [shape: bf16[128,128], index: 3, kind: input, shape index: {}]   ;;  %s1688_s4 = inlined_call_operand.vmem [shape: bf16[128,128], index: 4, kind: input, shape index: {}]   ;;  %s1689_s5 = inlined_call_operand.vmem [shape: bf16[128,128], index: 5, kind: input, shape index: {}]   ;;  %s1690_s6 = inlined_call_operand.vmem [shape: f32[1,128], index: 6, kind: input, shape index: {}]   ;;  %s1691_s7 = inlined_call_operand.vmem [shape: bf16[128,128], index: 7, kind: input, shape index: {}]   ;;  %s1692_s8 = inlined_call_operand.vmem [shape: f32[1,128], index: 8, kind: input, shape index: {}]   ;;  %s1693_s9 = inlined_call_operand.hbm [shape: f32[1,1], index: 9, kind: output, shape index: {}]  }
   0x1   :  { %v230_v0 = vld [vmem:[%s1684_s0 + $0x10] sm:$0xff]  ;;  %v228_v1 = vld [vmem:[%s1684_s0] sm:$0xff]  ;;  %1112 = vset.pattern.permute.xlu1 %v1182_v2  ;;  %1111 = vset.pattern.permute.xlu0 %v1182_v2  ;;  %v1249_v4 = vld [vmem:[%s1688_s4 + $0x38] sm:$0xff] }
   0x2   :  { %243 = vperm.xlu1 %1112, %v230_v0   ;;  %237 = vperm.xlu0 %1111, %v228_v1   ;;  %v232_v3 = vld [vmem:[%s1684_s0 + $0x20] sm:$0xff]  ;;  %v1077_v5 = vld [vmem:[%s1689_s5 + $0x38] sm:$0xff]  ;;  %v1258_v6 = vld [vmem:[%s1688_s4 + $0x30] sm:$0xff] }
   0x3   :  { %1113 = vset.pattern.permute.xlu2 %v1182_v2  ;;  %454 = vmatpush.bf16.msra.mxu2 %v1249_v4  ;;  %v1076_v7 = vld [vmem:[%s1689_s5 + $0x30] sm:$0xff]  ;;  %v1085_v8 = vld [vmem:[%s1687_s3 + $0x38] sm:$0xff]  ;;  %v229_v10 = vld [vmem:[%s1684_s0 + $0x8] sm:$0xff] }
   0x4   :  { %249 = vperm.xlu2 %1113, %v232_v3   ;;  %213 = vmatpush.bf16.msra.mxu0 %v1077_v5  ;;  %v231_v9 = vld [vmem:[%s1684_s0 + $0x18] sm:$0xff]  ;;  %v1084_v11 = vld [vmem:[%s1687_s3 + $0x30] sm:$0xff]  ;;  %v233_v12 = vld [vmem:[%s1684_s0 + $0x28] sm:$0xff] }
   0x5   :  { %344 = vmatpush.bf16.msra.mxu1 %v1085_v8  ;;  %v1282_v13 = vld [vmem:[%s1688_s4 + $0x28] sm:$0xff] }
   0x6   :  { %v1075_v14 = vld [vmem:[%s1689_s5 + $0x28] sm:$0xff] }
   0x7   :  { %455 = vmatpush.bf16.msra.mxu2 %v1258_v6 }
   0x8   :  { %214 = vmatpush.bf16.msra.mxu0 %v1076_v7 }
   0xa   :  { %246 = vperm.xlu1 %1112, %v231_v9   ;;  %240 = vperm.xlu0 %1111, %v229_v10  }
   0xb   :  { %14 = vsyncpa [#allocation3], 0  ;;  %345 = vmatpush.bf16.msra.mxu1 %v1084_v11  ;;  %v1083_v15 = vld [vmem:[%s1687_s3 + $0x28] sm:$0xff]  ;;  %456 = vmatpush.bf16.msra.mxu2 %v1282_v13  ;;  %v1294_v16 = vld [vmem:[%s1688_s4 + $0x20] sm:$0xff]  ;;  %v1183_v31 = vmov 8.0   ;;  %vm149_vm1 = vcmask 1041409  }
   0xc   :  { %252 = vperm.xlu2 %1113, %v233_v12   ;;  %215 = vmatpush.bf16.msra.mxu0 %v1075_v14  ;;  %v1074_v17 = vld [vmem:[%s1689_s5 + $0x20] sm:$0xff]  ;;  %v235_v18 = vld [vmem:[%s1684_s0 + $0x38] sm:$0xff]  ;;  %v234_v19 = vld [vmem:[%s1684_s0 + $0x30] sm:$0xff]  ;;  %1116 = vrcp.f32 %v1183_v31  ;;  %vm151_vm2 = vcmask 1042434   ;;  %vm153_vm3 = vcmask 1043459   ;;  %vm155_vm4 = vcmask 1044484  }
   0xd   :  { %v1082_v20 = vld [vmem:[%s1687_s3 + $0x20] sm:$0xff]  ;;  %v1312_v21 = vld [vmem:[%s1688_s4 + $0x18] sm:$0xff]  ;;  %v1324_v24 = vld [vmem:[%s1688_s4 + $0x10] sm:$0xff]  ;;  %vm157_vm5 = vcmask 1045509   ;;  %vm159_vm6 = vcmask 1046534   ;;  %vm161_vm7 = vcmask 1047559  }
   0xe   :  { %v1073_v22 = vld [vmem:[%s1689_s5 + $0x18] sm:$0xff]  ;;  %v1072_v25 = vld [vmem:[%s1689_s5 + $0x10] sm:$0xff]  ;;  %v593_v26 = vld [vmem:[%s1685_s1 + $0x8] sm:$0xff]  ;;  %s924_s28 = sshll.u32 %s1693_s9, 4  ;;  %s925_s28 = int_to_ptr.hbm [resolvable:$true] %s924_s28 }
   0xf   :  { %346 = vmatpush.bf16.msra.mxu1 %v1083_v15  ;;  %457 = vmatpush.bf16.msra.mxu2 %v1294_v16  ;;  %v1081_v23 = vld [vmem:[%s1687_s3 + $0x18] sm:$0xff]  ;;  %v1080_v27 = vld [vmem:[%s1687_s3 + $0x10] sm:$0xff]  ;;  %v1339_v28 = vld [vmem:[%s1688_s4 + $0x8] sm:$0xff] }
  0x10   :  { %216 = vmatpush.bf16.msra.mxu0 %v1074_v17  ;;  %v1071_v29 = vld [vmem:[%s1689_s5 + $0x8] sm:$0xff]  ;;  %v1348_v30 = vld [vmem:[%s1688_s4] sm:$0xff]  ;;  %v36_v34 = vld [vmem:[%s1686_s2 + $0x10] sm:$0xff]  ;;  %s1186_s4 = smov [#allocation2]  }
  0x11   :  { %v34_v32 = vld [vmem:[%s1686_s2] sm:$0xff]  ;;  %v35_v33 = vld [vmem:[%s1686_s2 + $0x8] sm:$0xff]  ;;  %v37_v37 = vld [vmem:[%s1686_s2 + $0x18] sm:$0xff]  ;;  %v54_v38 = vrot.slane %v36_v34, 4 }
  0x12   :  { %258 = vperm.xlu1 %1112, %v235_v18   ;;  %255 = vperm.xlu0 %1111, %v234_v19   ;;  %v42_v35 = vrot.slane %v34_v32, 4  ;;  %v48_v36 = vrot.slane %v35_v33, 4  ;;  %v1117_v39 = vpop.eup %1116  ;;  %v38_v40 = vld [vmem:[%s1686_s2 + $0x20] sm:$0xff]  ;;  %v60_v43 = vrot.slane %v37_v37, 4  ;;  %v39_v44 = vld [vmem:[%s1686_s2 + $0x28] sm:$0xff]  ;;  %v40_v48 = vld [vmem:[%s1686_s2 + $0x30] sm:$0xff] }
  0x13   :  { %347 = vmatpush.bf16.msra.mxu1 %v1082_v20  ;;  %458 = vmatpush.bf16.msra.mxu2 %v1312_v21  ;;  %v55_v45 = vadd.f32 %v54_v38, %v36_v34  ;;  %v66_v46 = vrot.slane %v38_v40, 4  ;;  %v91_v47 = vmul.f32 8.0, %v1117_v39  ;;  %v72_v52 = vrot.slane %v39_v44, 4  ;;  %v41_v53 = vld [vmem:[%s1686_s2 + $0x38] sm:$0xff] }
  0x14   :  { %217 = vmatpush.bf16.msra.mxu0 %v1073_v22  ;;  %v43_v41 = vadd.f32 %v42_v35, %v34_v32  ;;  %v49_v42 = vadd.f32 %v48_v36, %v35_v33  ;;  %v61_v51 = vadd.f32 %v60_v43, %v37_v37  ;;  %v78_v56 = vrot.slane %v40_v48, 4 }
  0x15   :  { %v56_v54 = vrot.slane %v55_v45, 2  ;;  %v67_v55 = vadd.f32 %v66_v46, %v38_v40  ;;  %v92_v57 = vsub.f32 1.0, %v91_v47  ;;  %v73_v61 = vadd.f32 %v72_v52, %v39_v44 }
  0x16   :  { %v44_v49 = vrot.slane %v43_v41, 2  ;;  %v50_v50 = vrot.slane %v49_v42, 2  ;;  %v62_v60 = vrot.slane %v61_v51, 2  ;;  %v79_v0 = vadd.f32 %v78_v56, %v40_v48 }
  0x17   :  { %348 = vmatpush.bf16.msra.mxu1 %v1081_v23  ;;  %459 = vmatpush.bf16.msra.mxu2 %v1324_v24  ;;  %v57_v62 = vadd.f32 %v56_v54, %v55_v45  ;;  %v68_v63 = vrot.slane %v67_v55, 2  ;;  %v84_v1 = vrot.slane %v41_v53, 4  ;;  %v74_v7 = vrot.slane %v73_v61, 2 }
  0x18   :  { %218 = vmatpush.bf16.msra.mxu0 %v1072_v25  ;;  %v45_v58 = vadd.f32 %v44_v49, %v43_v41  ;;  %v51_v59 = vadd.f32 %v50_v50, %v49_v42  ;;  %v63_v5 = vadd.f32 %v62_v60, %v61_v51  ;;  %v80_v10 = vrot.slane %v79_v0, 2 }
  0x19   :  { %v58_v8 = vrot.slane %v57_v62, 1  ;;  %v69_v9 = vadd.f32 %v68_v63, %v67_v55  ;;  %v85_v11 = vadd.f32 %v84_v1, %v41_v53  ;;  %v75_v14 = vadd.f32 %v74_v7, %v73_v61 }
  0x1a   :  { %595 = vperm.xlu0 %1111, %v593_v26   ;;  %v52_v3 = vrot.slane %v51_v59, 1  ;;  %v64_v12 = vrot.slane %v63_v5, 1  ;;  %v81_v17 = vadd.f32 %v80_v10, %v79_v0  ;;  %v93_v23 = vmul.f32 %v1117_v39, %v92_v57  ;;  %v1079_v0 = vld [vmem:[%s1687_s3 + $0x8] sm:$0xff] }
  0x1b   :  { %349 = vmatpush.bf16.msra.mxu1 %v1080_v27  ;;  %460 = vmatpush.bf16.msra.mxu2 %v1339_v28  ;;  %v70_v15 = vrot.slane %v69_v9, 1  ;;  %v86_v18 = vrot.slane %v85_v11, 2  ;;  %v76_v22 = vrot.slane %v75_v14, 1  ;;  %v59_v25 = vadd.f32 %v58_v8, %v57_v62 }
  0x1c   :  { %219 = vmatpush.bf16.msra.mxu0 %v1071_v29  ;;  %v53_v20 = vadd.f32 %v52_v3, %v51_v59  ;;  %v82_v26 = vrot.slane %v81_v17, 1  ;;  %vm95_vm0 = vweird.f32 %v1117_v39  ;;  %v65_v29 = vadd.f32 %v64_v12, %v63_v5  ;;  %v1078_v5 = vld [vmem:[%s1687_s3] sm:$0xff] }
  0x1d   :  { %v87_v27 = vadd.f32 %v86_v18, %v85_v11  ;;  %v71_v31 = vadd.f32 %v70_v15, %v69_v9  ;;  %v77_v32 = vadd.f32 %v76_v22, %v75_v14  ;;  %v94_v33 = vadd.f32 %v1117_v39, %v93_v23  ;;  %v1413_v22 = vld [vmem:[%s1691_s7 + $0x38] sm:$0xff]  ;;  %v1420_v23 = vld [vmem:[%s1691_s7 + $0x30] sm:$0xff] }
  0x1e   :  { %v83_v34 = vadd.f32 %v82_v26, %v81_v17  ;;  %v226_v12 = vlaneseq  ;;  %v1184_v18 = vmov 1.0|1.0   ;;  %521 = vmatpush.bf16.msra.mxu3 %v1413_v22 }
  0x1f   :  { %461 = vmatpush.bf16.msra.mxu2 %v1348_v30  ;;  %v88_v35 = vrot.slane %v87_v27, 1  ;;  %v96_v36 = vsel %vm95_vm0, %v1117_v39, %v94_v33  ;;  %v1070_v39 = vld [vmem:[%s1689_s5] sm:$0xff]  ;;  %350 = vmatpush.bf16.msra.mxu1 %v1079_v0  ;;  %v1451_v33 = vld [vmem:[%s1691_s7 + $0x18] sm:$0xff] }
  0x20   :  { %v98_v40 = vmul.f32 %v96_v36, %v53_v20  ;;  %v99_v41 = vmul.f32 %v96_v36, %v59_v25  ;;  %v100_v42 = vmul.f32 %v96_v36, %v65_v29  ;;  %v101_v43 = vmul.f32 %v96_v36, %v71_v31  ;;  %220 = vmatpush.bf16.msra.mxu0 %v1070_v39  ;;  %v1429_v25 = vld [vmem:[%s1691_s7 + $0x28] sm:$0xff]  ;;  %v1536_v39 = vld [vmem:[%s1692_s8] ss:$0 sm:$0xff] }
  0x21   :  { %v89_v37 = vadd.f32 %v88_v35, %v87_v27  ;;  %v102_v44 = vmul.f32 %v96_v36, %v77_v32  ;;  %v103_v45 = vmul.f32 %v96_v36, %v83_v34  ;;  %v1400_v14 = vand.u32 127, %v226_v12  ;;  %v1445_v32 = vld [vmem:[%s1691_s7 + $0x20] sm:$0xff] }
  0x22   :  { %462 = vmatmul.bf16.vlgmr.msra.gmra.mxu2 %v1182_v2  ;;  %v46_v2 = vrot.slane %v45_v58, 1  ;;  %v106_v48 = vpack.c.bf16 %v98_v40, %v98_v40  ;;  %v107_v49 = vpack.c.bf16 %v99_v41, %v99_v41  ;;  %v108_v50 = vpack.c.bf16 %v100_v42, %v100_v42  ;;  %522 = vmatpush.bf16.msra.mxu3 %v1420_v23  ;;  %v1476_v40 = vld [vmem:[%s1691_s7] sm:$0xff]  ;;  %v642_v42 = vld [vmem:[%s1685_s1 + $0x10] sm:$0xff] }
  0x23   :  { %v104_v46 = vmul.f32 %v96_v36, %v89_v37  ;;  %v109_v51 = vpack.c.bf16 %v101_v43, %v101_v43  ;;  %v110_v52 = vpack.c.bf16 %v102_v44, %v102_v44  ;;  %v111_v53 = vpack.c.bf16 %v103_v45, %v103_v45  ;;  %351 = vmatpush.bf16.msra.mxu1 %v1078_v5  ;;  %v544_v41 = vld [vmem:[%s1685_s1] sm:$0xff] }
  0x24   :  { %v47_v19 = vadd.f32 %v46_v2, %v45_v58  ;;  %v142_v55 = vunpack.c.l.b16 %v106_v48  ;;  %v143_v57 = vunpack.c.l.b16 %v107_v49  ;;  %v144_v58 = vunpack.c.l.b16 %v108_v50  ;;  %554 = vmatpush.bf16.msrb.mxu0 %v1249_v4  ;;  %570 = vmatpush.bf16.msrb.mxu2 %v1413_v22  ;;  %v1114_v43 = vld [vmem:[%s1690_s6] ss:$0 sm:$0xff] }
  0x25   :  { %v112_v56 = vpack.c.bf16 %v104_v46, %v104_v46  ;;  %v145_v59 = vunpack.c.l.b16 %v109_v51  ;;  %v146_v60 = vunpack.c.l.b16 %v110_v52  ;;  %v147_v62 = vunpack.c.l.b16 %v111_v53  ;;  %546 = vperm.xlu1 %1112, %v544_v41   ;;  %v740_v46 = vld [vmem:[%s1685_s1 + $0x20] sm:$0xff]  ;;  %v691_v51 = vld [vmem:[%s1685_s1 + $0x18] sm:$0xff] }
  0x26   :  { %v97_v38 = vmul.f32 %v96_v36, %v47_v19  ;;  %523 = vmatpush.bf16.msra.mxu3 %v1429_v25  ;;  %v1461_v36 = vld [vmem:[%s1691_s7 + $0x10] sm:$0xff]  ;;  %693 = vperm.xlu2 %1113, %v691_v51  }
  0x27   :  { %v148_v1 = vunpack.c.l.b16 %v112_v56  ;;  %652 = vmatpush.bf16.msrb.mxu1 %v1249_v4 }
  0x28   :  { %v105_v47 = vpack.c.bf16 %v97_v38, %v97_v38  ;;  %555 = vmatpush.bf16.msrb.mxu0 %v1258_v6  ;;  %571 = vmatpush.bf16.msrb.mxu2 %v1420_v23  ;;  %v1469_v38 = vld [vmem:[%s1691_s7 + $0x8] sm:$0xff] }
  0x2a   :  { %v141_v54 = vunpack.c.l.b16 %v105_v47  ;;  %524 = vmatpush.bf16.msra.mxu3 %v1445_v32 }
  0x2b   :  { %653 = vmatpush.bf16.msrb.mxu1 %v1258_v6 }
  0x2c   :  { %v150_v61 = vsel %vm149_vm1, %v142_v55, %v141_v54  ;;  %556 = vmatpush.bf16.msrb.mxu0 %v1282_v13  ;;  %572 = vmatpush.bf16.msrb.mxu2 %v1429_v25 }
  0x2d   :  { %v152_v63 = vsel %vm151_vm2, %v143_v57, %v150_v61  ;;  %644 = vperm.xlu1 %1112, %v642_v42  }
  0x2e   :  { %v154_v2 = vsel %vm153_vm3, %v144_v58, %v152_v63  ;;  %525 = vmatpush.bf16.msra.mxu3 %v1451_v33 }
  0x2f   :  { %v156_v3 = vsel %vm155_vm4, %v145_v59, %v154_v2  ;;  %654 = vmatpush.bf16.msrb.mxu1 %v1282_v13 }
  0x30   :  { %v158_v7 = vsel %vm157_vm5, %v146_v60, %v156_v3  ;;  %557 = vmatpush.bf16.msrb.mxu0 %v1294_v16  ;;  %573 = vmatpush.bf16.msrb.mxu2 %v1445_v32 }
  0x31   :  { %v160_v8 = vsel %vm159_vm6, %v147_v62, %v158_v7 }
  0x32   :  { %v162_v9 = vsel %vm161_vm7, %v148_v1, %v160_v8  ;;  %526 = vmatpush.bf16.msra.mxu3 %v1461_v36 }
  0x33   :  { %v163_v10 = vpack.c.b16 %v162_v9, %v162_v9  ;;  %655 = vmatpush.bf16.msrb.mxu1 %v1294_v16 }
  0x34   :  { %558 = vmatpush.bf16.msrb.mxu0 %v1312_v21  ;;  %574 = vmatpush.bf16.msrb.mxu2 %v1451_v33 }
  0x35   :  { %221 = vmatmul.bf16.vlgmr.msra.gmra.mxu0 %v163_v10  ;;  %742 = vperm.xlu1 %1112, %v740_v46  }
  0x36   :  { %527 = vmatpush.bf16.msra.mxu3 %v1469_v38 }
  0x37   :  { %656 = vmatpush.bf16.msrb.mxu1 %v1312_v21 }
  0x38   :  { %559 = vmatpush.bf16.msrb.mxu0 %v1324_v24  ;;  %575 = vmatpush.bf16.msrb.mxu2 %v1461_v36 }
  0x3a   :  { %528 = vmatpush.bf16.msra.mxu3 %v1476_v40 }
  0x3b   :  { %657 = vmatpush.bf16.msrb.mxu1 %v1324_v24 }
  0x3c   :  { %560 = vmatpush.bf16.msrb.mxu0 %v1339_v28  ;;  %576 = vmatpush.bf16.msrb.mxu2 %v1469_v38 }
  0x3e   :  { %603 = vmatpush.bf16.msrb.mxu3 %v1249_v4 }
  0x3f   :  { %658 = vmatpush.bf16.msrb.mxu1 %v1339_v28 }
  0x40   :  { %561 = vmatpush.bf16.msrb.mxu0 %v1348_v30  ;;  %577 = vmatpush.bf16.msrb.mxu2 %v1476_v40 }
  0x42   :  { %604 = vmatpush.bf16.msrb.mxu3 %v1258_v6 }
  0x43   :  { %659 = vmatpush.bf16.msrb.mxu1 %v1348_v30 }
  0x44   :  { %619 = vmatpush.bf16.msra.mxu0 %v1413_v22  ;;  %668 = vmatpush.bf16.msra.mxu2 %v1413_v22 }
  0x46   :  { %605 = vmatpush.bf16.msrb.mxu3 %v1282_v13 }
  0x48   :  { %620 = vmatpush.bf16.msra.mxu0 %v1420_v23  ;;  %669 = vmatpush.bf16.msra.mxu2 %v1420_v23 }
  0x4a   :  { %606 = vmatpush.bf16.msrb.mxu3 %v1294_v16 }
  0x4c   :  { %621 = vmatpush.bf16.msra.mxu0 %v1429_v25  ;;  %670 = vmatpush.bf16.msra.mxu2 %v1429_v25 }
  0x4e   :  { %607 = vmatpush.bf16.msrb.mxu3 %v1312_v21 }
  0x50   :  { %622 = vmatpush.bf16.msra.mxu0 %v1445_v32  ;;  %671 = vmatpush.bf16.msra.mxu2 %v1445_v32 }
  0x52   :  { %608 = vmatpush.bf16.msrb.mxu3 %v1324_v24 }
  0x54   :  { %623 = vmatpush.bf16.msra.mxu0 %v1451_v33  ;;  %672 = vmatpush.bf16.msra.mxu2 %v1451_v33 }
  0x56   :  { %609 = vmatpush.bf16.msrb.mxu3 %v1339_v28 }
  0x58   :  { %624 = vmatpush.bf16.msra.mxu0 %v1461_v36  ;;  %673 = vmatpush.bf16.msra.mxu2 %v1461_v36 }
  0x5a   :  { %610 = vmatpush.bf16.msrb.mxu3 %v1348_v30 }
  0x5c   :  { %625 = vmatpush.bf16.msra.mxu0 %v1469_v38  ;;  %674 = vmatpush.bf16.msra.mxu2 %v1469_v38 }
  0x5e   :  { %v250_v20 = vpop.permute.xlu2 %249 }
  0x5f   :  { %vm264_vm14 = vcmp.eq.s32.totalorder %v1400_v14, %v250_v20 }
  0x60   :  { %626 = vmatpush.bf16.msra.mxu0 %v1476_v40  ;;  %675 = vmatpush.bf16.msra.mxu2 %v1476_v40 }
  0x66   :  { %v253_v26 = vpop.permute.xlu2 %252 }
  0x67   :  { %vm265_vm15 = vcmp.eq.s32.totalorder %v1400_v14, %v253_v26 }
  0x68   :  { %vm1002_vm0 = vmpackc.low %vm265_vm15, %vm264_vm14 }
  0x74   :  { %v238_v11 = vpop.permute.xlu0 %237  ;;  %v244_v17 = vpop.permute.xlu1 %243 }
  0x75   :  { %vm260_vm9 = vcmp.eq.s32.totalorder %v1400_v14, %v238_v11  ;;  %vm262_vm11 = vcmp.eq.s32.totalorder %v1400_v14, %v244_v17 }
  0x7c   :  { %v241_v15 = vpop.permute.xlu0 %240  ;;  %v247_v19 = vpop.permute.xlu1 %246 }
  0x7d   :  { %vm261_vm8 = vcmp.eq.s32.totalorder %v1400_v14, %v241_v15  ;;  %vm263_vm12 = vcmp.eq.s32.totalorder %v1400_v14, %v247_v19 }
  0x7e   :  { %vm998_vm10 = vmpackc.low %vm261_vm8, %vm260_vm9 }
  0x7f   :  { %999 = vmatmul.msk.bf16.vlgmr.msra.gmra.mxu1 %vm998_vm10, %v1184_v18  ;;  %vm1000_vm13 = vmpackc.low %vm263_vm12, %vm262_vm11  ;;  %vm897_vm12 = vcmask 7168  }
  0x80   :  { %750 = vmatpush.bf16.msra.mxu1 %v1249_v4  ;;  %v1556_v0 = vpop.permute.xlu2 %693 }
  0x81   :  { %vm695_vm10 = vcmp.eq.s32.totalorder %v1400_v14, %v1556_v0 }
  0x84   :  { %751 = vmatpush.bf16.msra.mxu1 %v1258_v6  ;;  %v259_v27 = vpop.permute.xlu1 %258  ;;  %v256_v29 = vpop.permute.xlu0 %255 }
  0x85   :  { %vm267_vm1 = vcmp.eq.s32.totalorder %v1400_v14, %v259_v27  ;;  %vm266_vm2 = vcmp.eq.s32.totalorder %v1400_v14, %v256_v29 }
  0x86   :  { %vm1004_vm3 = vmpackc.low %vm267_vm1, %vm266_vm2 }
  0x88   :  { %752 = vmatpush.bf16.msra.mxu1 %v1282_v13 }
  0x8c   :  { %753 = vmatpush.bf16.msra.mxu1 %v1294_v16 }
  0x8f   :  { %1001 = vmatmul.msk.bf16.gmra.mxu1 %vm1000_vm13, %v1184_v18 }
  0x90   :  { %754 = vmatpush.bf16.msra.mxu1 %v1312_v21 }
  0x94   :  { %755 = vmatpush.bf16.msra.mxu1 %v1324_v24 }
  0x97   :  { %v547_v56 = vpop.permute.xlu1 %546 }
  0x98   :  { %756 = vmatpush.bf16.msra.mxu1 %v1339_v28  ;;  %vm548_vm4 = vcmp.eq.s32.totalorder %v1400_v14, %v547_v56 }
  0x9c   :  { %757 = vmatpush.bf16.msra.mxu1 %v1348_v30 }
  0x9f   :  { %1003 = vmatmul.msk.bf16.gmra.mxu1 %vm1002_vm0, %v1184_v18 }
  0xa5   :  { %v463_v31 = vpop.f32.mrf.mxu2 }
  0xad   :  { %v465_v34 = vpop.f32.mrf.mxu2 }
  0xaf   :  { %1005 = vmatmul.msk.bf16.gmra.mxu1 %vm1004_vm3, %v1184_v18 }
  0xb2   :  { %v222_v35 = vpop.f32.mrf.mxu0 }
  0xb3   :  { %v1501_v44 = vadd.f32 %v1114_v43, %v222_v35 }
  0xba   :  { %v224_v37 = vpop.f32.mrf.mxu0 }
  0xfc   :  { %v353_v45 = vpop.f32.mrf.mxu1 }
  0xfd   :  { %v464_v47 = vadd.f32 %v463_v31, %v353_v45 }
  0xff   :  { %v467_v48 = vadd.f32 %v464_v47, %v1501_v44 }
 0x101   :  { %1118 = vtanh.f32 %v467_v48 }
 0x104   :  { %v355_v52 = vpop.f32.mrf.mxu1 }
 0x107   :  { %v1119_v49 = vpop.eup %1118 }
 0x108   :  { %v469_v50 = vpack.c.bf16 %v1119_v49, %v1119_v49 }
 0x10a   :  { %529 = vmatmul.bf16.vlgmr.msra.gmra.mxu3 %v469_v50  ;;  %562 = vmatmul.bf16.vlgmr.msrb.gmra.mxu0 %v469_v50 }
 0x10b   :  { %701 = vmatpush.bf16.msra.mxu3 %v1249_v4  ;;  %717 = vmatpush.bf16.msrb.mxu0 %v1413_v22 }
 0x10c   :  { %v358_v7 = vpop.f32.mrf.mxu1 }
 0x10f   :  { %702 = vmatpush.bf16.msra.mxu3 %v1258_v6  ;;  %718 = vmatpush.bf16.msrb.mxu0 %v1420_v23 }
 0x113   :  { %703 = vmatpush.bf16.msra.mxu3 %v1282_v13  ;;  %719 = vmatpush.bf16.msrb.mxu0 %v1429_v25 }
 0x117   :  { %704 = vmatpush.bf16.msra.mxu3 %v1294_v16  ;;  %720 = vmatpush.bf16.msrb.mxu0 %v1445_v32 }
 0x11b   :  { %705 = vmatpush.bf16.msra.mxu3 %v1312_v21  ;;  %721 = vmatpush.bf16.msrb.mxu0 %v1451_v33 }
 0x11f   :  { %706 = vmatpush.bf16.msra.mxu3 %v1324_v24  ;;  %722 = vmatpush.bf16.msrb.mxu0 %v1461_v36 }
 0x123   :  { %707 = vmatpush.bf16.msra.mxu3 %v1339_v28  ;;  %723 = vmatpush.bf16.msrb.mxu0 %v1469_v38 }
 0x127   :  { %708 = vmatpush.bf16.msra.mxu3 %v1348_v30  ;;  %724 = vmatpush.bf16.msrb.mxu0 %v1476_v40 }
 0x187   :  { %v563_v53 = vpop.f32.mrf.mxu0 }
 0x188   :  { %v564_v54 = vadd.f32 %v563_v53, %v355_v52 }
 0x18a   :  { %v567_v55 = vadd.f32 %v564_v54, %v1501_v44 }
 0x18c   :  { %1120 = vtanh.f32 %v567_v55 }
 0x18d   :  { %v530_v57 = vpop.f32.mrf.mxu3 }
 0x18e   :  { %v531_v58 = vadd.f32 %v1536_v39, %v530_v57 }
 0x18f   :  { %v565_v59 = vpop.f32.mrf.mxu0 }
 0x190   :  { %534 = vmax.xlane.f32.xlu2 %v531_v58  ;;  %v549_v60 = vsel %vm548_vm4, %v531_v58, 0.0 }
 0x191   :  { %550 = vadd.xlane.f32.xlu1 %v549_v60 }
 0x192   :  { %v1121_v61 = vpop.eup %1120 }
 0x193   :  { %v569_v62 = vpack.c.bf16 %v1121_v61, %v1121_v61 }
 0x195   :  { %v532_v63 = vpop.f32.mrf.mxu3  ;;  %578 = vmatmul.bf16.vlgmr.msrb.gmra.mxu2 %v569_v62  ;;  %611 = vmatmul.bf16.vlgmr.msrb.gmra.mxu3 %v569_v62 }
 0x196   :  { %766 = vmatpush.bf16.msrb.mxu2 %v1413_v22  ;;  %799 = vmatpush.bf16.msrb.mxu3 %v1249_v4  ;;  %v838_v63 = vld [vmem:[%s1685_s1 + $0x30] sm:$0xff] }
 0x19a   :  { %767 = vmatpush.bf16.msrb.mxu2 %v1420_v23  ;;  %800 = vmatpush.bf16.msrb.mxu3 %v1258_v6 }
 0x19e   :  { %768 = vmatpush.bf16.msrb.mxu2 %v1429_v25  ;;  %801 = vmatpush.bf16.msrb.mxu3 %v1282_v13 }
 0x1a2   :  { %769 = vmatpush.bf16.msrb.mxu2 %v1445_v32  ;;  %802 = vmatpush.bf16.msrb.mxu3 %v1294_v16 }
 0x1a6   :  { %770 = vmatpush.bf16.msrb.mxu2 %v1451_v33  ;;  %803 = vmatpush.bf16.msrb.mxu3 %v1312_v21 }
 0x1aa   :  { %771 = vmatpush.bf16.msrb.mxu2 %v1461_v36  ;;  %804 = vmatpush.bf16.msrb.mxu3 %v1324_v24 }
 0x1ae   :  { %772 = vmatpush.bf16.msrb.mxu2 %v1469_v38  ;;  %805 = vmatpush.bf16.msrb.mxu3 %v1339_v28 }
 0x1b2   :  { %773 = vmatpush.bf16.msrb.mxu2 %v1476_v40  ;;  %806 = vmatpush.bf16.msrb.mxu3 %v1348_v30 }
 0x203   :  { %v1558_v1 = vpop.xlane.xlu2 %534 }
 0x204   :  { %v536_v2 = vsub.f32 %v531_v58, %v1558_v1 }
 0x206   :  { %v537_v3 = vmul.f32 1.442695, %v536_v2  ;;  %v1616_v2 = vpop.permute.xlu1 %644 }
 0x207   :  { %vm646_vm8 = vcmp.eq.s32.totalorder %v1400_v14, %v1616_v2 }
 0x208   :  { %1122 = vpow2.f32 %v537_v3 }
 0x20e   :  { %v1123_v5 = vpop.eup %1122  ;;  %v743_v3 = vpop.permute.xlu1 %742 }
 0x20f   :  { %539 = vadd.xlane.f32.xlu0 %v1123_v5  ;;  %vm744_vm5 = vcmp.eq.s32.totalorder %v1400_v14, %v743_v3 }
 0x216   :  { %v1618_v5 = vpop.xlane.xlu1 %550 }
 0x218   :  { %v579_v8 = vpop.f32.mrf.mxu2  ;;  %v612_v9 = vpop.f32.mrf.mxu3 }
 0x219   :  { %v1562_v10 = vadd.f32 %v1536_v39, %v579_v8  ;;  %v613_v11 = vadd.f32 %v612_v9, %v358_v7 }
 0x21b   :  { %v616_v12 = vadd.f32 %v613_v11, %v1501_v44  ;;  %583 = vmax.xlane.f32.xlu2 %v1562_v10 }
 0x21d   :  { %1124 = vtanh.f32 %v616_v12 }
 0x220   :  { %v581_v15 = vpop.f32.mrf.mxu2  ;;  %v614_v17 = vpop.f32.mrf.mxu3 }
 0x223   :  { %v1125_v18 = vpop.eup %1124 }
 0x224   :  { %v618_v19 = vpack.c.bf16 %v1125_v18, %v1125_v18 }
 0x226   :  { %627 = vmatmul.bf16.vlgmr.msra.gmra.mxu0 %v618_v19  ;;  %660 = vmatmul.bf16.vlgmr.msrb.gmra.mxu1 %v618_v19 }
 0x227   :  { %815 = vmatpush.bf16.msra.mxu0 %v1413_v22  ;;  %848 = vmatpush.bf16.msrb.mxu1 %v1249_v4  ;;  %v360_v4 = vpop.f32.mrf.mxu1 }
 0x22b   :  { %816 = vmatpush.bf16.msra.mxu0 %v1420_v23  ;;  %849 = vmatpush.bf16.msrb.mxu1 %v1258_v6 }
 0x22f   :  { %817 = vmatpush.bf16.msra.mxu0 %v1429_v25  ;;  %850 = vmatpush.bf16.msrb.mxu1 %v1282_v13  ;;  %v363_v6 = vpop.f32.mrf.mxu1 }
 0x233   :  { %818 = vmatpush.bf16.msra.mxu0 %v1445_v32  ;;  %851 = vmatpush.bf16.msrb.mxu1 %v1294_v16 }
 0x237   :  { %819 = vmatpush.bf16.msra.mxu0 %v1451_v33  ;;  %852 = vmatpush.bf16.msrb.mxu1 %v1312_v21  ;;  %v365_v13 = vpop.f32.mrf.mxu1 }
 0x23b   :  { %820 = vmatpush.bf16.msra.mxu0 %v1461_v36  ;;  %853 = vmatpush.bf16.msrb.mxu1 %v1324_v24 }
 0x23f   :  { %821 = vmatpush.bf16.msra.mxu0 %v1469_v38  ;;  %854 = vmatpush.bf16.msrb.mxu1 %v1339_v28  ;;  %v368_v20 = vpop.f32.mrf.mxu1 }
 0x243   :  { %822 = vmatpush.bf16.msra.mxu0 %v1476_v40  ;;  %855 = vmatpush.bf16.msrb.mxu1 %v1348_v30 }
 0x247   :  { %v1586_v27 = vpop.f32.mrf.mxu1 }
 0x28e   :  { %v1582_v16 = vpop.xlane.xlu2 %583 }
 0x28f   :  { %v585_v21 = vsub.f32 %v1562_v10, %v1582_v16 }
 0x291   :  { %v586_v26 = vmul.f32 1.442695, %v585_v21 }
 0x293   :  { %1126 = vpow2.f32 %v586_v26 }
 0x299   :  { %v1127_v24 = vpop.eup %1126 }
 0x29a   :  { %588 = vadd.xlane.f32.xlu2 %v1127_v24 }
 0x2a3   :  { %v628_v28 = vpop.f32.mrf.mxu0  ;;  %v661_v29 = vpop.f32.mrf.mxu1 }
 0x2a4   :  { %v1589_v31 = vadd.f32 %v1536_v39, %v628_v28  ;;  %v662_v30 = vadd.f32 %v661_v29, %v360_v4 }
 0x2a6   :  { %v665_v34 = vadd.f32 %v662_v30, %v1501_v44  ;;  %632 = vmax.xlane.f32.xlu2 %v1589_v31 }
 0x2a8   :  { %1128 = vtanh.f32 %v665_v34  ;;  %v596_v34 = vpop.permute.xlu0 %595 }
 0x2a9   :  { %vm597_vm7 = vcmp.eq.s32.totalorder %v1400_v14, %v596_v34 }
 0x2ab   :  { %v630_v35 = vpop.f32.mrf.mxu0  ;;  %v663_v37 = vpop.f32.mrf.mxu1 }
 0x2ae   :  { %v1129_v41 = vpop.eup %1128 }
 0x2af   :  { %v667_v42 = vpack.c.bf16 %v1129_v41, %v1129_v41 }
 0x2b0   :  { %v540_v35 = vpop.xlane.xlu0 %539 }
 0x2b1   :  { %676 = vmatmul.bf16.vlgmr.msra.gmra.mxu2 %v667_v42  ;;  %709 = vmatmul.bf16.vlgmr.msra.gmra.mxu3 %v667_v42 }
 0x2b2   :  { %864 = vmatpush.bf16.msra.mxu2 %v1413_v22 }
 0x2b6   :  { %865 = vmatpush.bf16.msra.mxu2 %v1420_v23 }
 0x2ba   :  { %866 = vmatpush.bf16.msra.mxu2 %v1429_v25 }
 0x2be   :  { %867 = vmatpush.bf16.msra.mxu2 %v1445_v32 }
 0x2c2   :  { %868 = vmatpush.bf16.msra.mxu2 %v1451_v33 }
 0x2c6   :  { %869 = vmatpush.bf16.msra.mxu2 %v1461_v36 }
 0x2ca   :  { %870 = vmatpush.bf16.msra.mxu2 %v1469_v38 }
 0x2ce   :  { %871 = vmatpush.bf16.msra.mxu2 %v1476_v40 }
 0x30d   :  { %v1633_v26 = vpop.xlane.xlu2 %588 }
 0x319   :  { %v1635_v24 = vpop.xlane.xlu2 %632 }
 0x334   :  { %v677_v43 = vpop.f32.mrf.mxu2  ;;  %v710_v45 = vpop.f32.mrf.mxu3 }
 0x335   :  { %v1602_v46 = vadd.f32 %v1536_v39, %v677_v43  ;;  %v711_v22 = vadd.f32 %v710_v45, %v363_v6 }
 0x337   :  { %v714_v23 = vadd.f32 %v711_v22, %v1501_v44  ;;  %681 = vmax.xlane.f32.xlu1 %v1602_v46 }
 0x339   :  { %1130 = vtanh.f32 %v714_v23 }
 0x33c   :  { %v679_v25 = vpop.f32.mrf.mxu2  ;;  %v712_v32 = vpop.f32.mrf.mxu3 }
 0x33f   :  { %v1131_v33 = vpop.eup %1130 }
 0x340   :  { %v716_v47 = vpack.c.bf16 %v1131_v33, %v1131_v33  ;;  %v789_v33 = vld [vmem:[%s1685_s1 + $0x28] sm:$0xff] }
 0x342   :  { %725 = vmatmul.bf16.vlgmr.msrb.gmra.mxu0 %v716_v47  ;;  %758 = vmatmul.bf16.vlgmr.msra.gmra.mxu1 %v716_v47  ;;  %v634_v47 = vsub.f32 %v1589_v31, %v1635_v24 }
 0x3aa   :  { %v1620_v7 = vpop.xlane.xlu1 %681 }
 0x3ab   :  { %v683_v8 = vsub.f32 %v1602_v46, %v1620_v7 }
 0x3ad   :  { %v684_v9 = vmul.f32 1.442695, %v683_v8 }
 0x3bf   :  { %v726_v36 = vpop.f32.mrf.mxu0  ;;  %v759_v38 = vpop.f32.mrf.mxu1 }
 0x3c0   :  { %v727_v40 = vadd.f32 %v1536_v39, %v726_v36  ;;  %v760_v48 = vadd.f32 %v759_v38, %v365_v13  ;;  %v635_v36 = vmul.f32 1.442695, %v634_v47 }
 0x3c2   :  { %v763_v49 = vadd.f32 %v760_v48, %v1501_v44  ;;  %730 = vmax.xlane.f32.xlu2 %v727_v40  ;;  %v745_v30 = vsel %vm744_vm5, %v727_v40, 0.0 }
 0x3c4   :  { %1132 = vtanh.f32 %v763_v49 }
 0x3c7   :  { %v728_v50 = vpop.f32.mrf.mxu0  ;;  %v761_v51 = vpop.f32.mrf.mxu1 }
 0x3c8   :  { %v598_v50 = vsel %vm597_vm7, %v1562_v10, 0.0  ;;  %v647_v51 = vsel %vm646_vm8, %v1589_v31, 0.0  ;;  %v696_v10 = vsel %vm695_vm10, %v1602_v46, 0.0 }
 0x3ca   :  { %v1133_v52 = vpop.eup %1132 }
 0x3cb   :  { %v765_v53 = vpack.c.bf16 %v1133_v52, %v1133_v52 }
 0x3cd   :  { %774 = vmatmul.bf16.vlgmr.msrb.gmra.mxu2 %v765_v53  ;;  %807 = vmatmul.bf16.vlgmr.msrb.gmra.mxu3 %v765_v53 }
 0x450   :  { %v775_v54 = vpop.f32.mrf.mxu2  ;;  %v808_v55 = vpop.f32.mrf.mxu3 }
 0x451   :  { %v1609_v56 = vadd.f32 %v1536_v39, %v775_v54  ;;  %v809_v57 = vadd.f32 %v808_v55, %v368_v20  ;;  %v887_v20 = vld [vmem:[%s1685_s1 + $0x38] sm:$0xff] }
 0x453   :  { %v812_v58 = vadd.f32 %v809_v57, %v1501_v44  ;;  %779 = vmax.xlane.f32.xlu1 %v1609_v56 }
 0x455   :  { %1134 = vtanh.f32 %v812_v58 }
 0x456   :  { %1136 = vpow2.f32 %v684_v9 }
 0x458   :  { %v777_v59 = vpop.f32.mrf.mxu2  ;;  %v810_v60 = vpop.f32.mrf.mxu3 }
 0x45b   :  { %v1135_v61 = vpop.eup %1134 }
 0x45c   :  { %v814_v62 = vpack.c.bf16 %v1135_v61, %v1135_v61  ;;  %v1137_v11 = vpop.eup %1136 }
 0x45e   :  { %823 = vmatmul.bf16.vlgmr.msra.gmra.mxu0 %v814_v62  ;;  %856 = vmatmul.bf16.vlgmr.msrb.gmra.mxu1 %v814_v62 }
 0x46c   :  { %840 = vperm.xlu1 %1112, %v838_v63  }
 0x496   :  { %686 = vadd.xlane.f32.xlu1 %v1137_v11 }
 0x4c6   :  { %v1652_v38 = vpop.xlane.xlu1 %779 }
 0x4db   :  { %v824_v12 = vpop.f32.mrf.mxu0  ;;  %v857_v15 = vpop.f32.mrf.mxu1 }
 0x4dc   :  { %v1625_v17 = vadd.f32 %v1536_v39, %v824_v12  ;;  %v858_v18 = vadd.f32 %v857_v15, %v1586_v27  ;;  %v1637_v27 = vpop.xlane.xlu2 %730 }
 0x4de   :  { %v861_v19 = vadd.f32 %v858_v18, %v1501_v44  ;;  %828 = vmax.xlane.f32.xlu0 %v1625_v17  ;;  %v732_v44 = vsub.f32 %v727_v40, %v1637_v27  ;;  %v841_v31 = vpop.permute.xlu1 %840 }
 0x4df   :  { %vm842_vm11 = vcmp.eq.s32.totalorder %v1400_v14, %v841_v31 }
 0x4e0   :  { %1138 = vtanh.f32 %v861_v19  ;;  %v733_v28 = vmul.f32 1.442695, %v732_v44  ;;  %v843_v59 = vsel %vm842_vm11, %v1625_v17, 0.0 }
 0x4e2   :  { %1140 = vpow2.f32 %v733_v28 }
 0x4e3   :  { %v826_v4 = vpop.f32.mrf.mxu0  ;;  %v859_v6 = vpop.f32.mrf.mxu1 }
 0x4e6   :  { %v1139_v13 = vpop.eup %1138 }
 0x4e7   :  { %v863_v21 = vpack.c.bf16 %v1139_v13, %v1139_v13 }
 0x4e8   :  { %v1141_v29 = vpop.eup %1140 }
 0x4e9   :  { %872 = vmatmul.bf16.vlgmr.msra.gmra.mxu2 %v863_v21 }
 0x4f2   :  { %889 = vperm.xlu0 %1111, %v887_v20  }
 0x509   :  { %v687_v62 = vpop.xlane.xlu1 %686 }
 0x51c   :  { %735 = vadd.xlane.f32.xlu0 %v1141_v29 }
 0x524   :  { %746 = vadd.xlane.f32.xlu0 %v745_v30 }
 0x551   :  { %v1641_v37 = vpop.xlane.xlu0 %828 }
 0x552   :  { %v830_v41 = vsub.f32 %v1625_v17, %v1641_v37 }
 0x554   :  { %v831_v42 = vmul.f32 1.442695, %v830_v41 }
 0x556   :  { %1142 = vpow2.f32 %v831_v42 }
 0x557   :  { %1144 = vpow2.f32 %v635_v36 }
 0x55c   :  { %v1143_v43 = vpop.eup %1142 }
 0x55d   :  { %833 = vadd.xlane.f32.xlu1 %v1143_v43  ;;  %v1145_v48 = vpop.eup %1144 }
 0x564   :  { %v890_v45 = vpop.permute.xlu0 %889 }
 0x565   :  { %vm891_vm6 = vcmp.eq.s32.totalorder %v1400_v14, %v890_v45 }
 0x56c   :  { %v873_v22 = vpop.f32.mrf.mxu2 }
 0x56d   :  { %v874_v23 = vadd.f32 %v1536_v39, %v873_v22  ;;  %v781_v39 = vsub.f32 %v1609_v56, %v1652_v38 }
 0x56f   :  { %877 = vmax.xlane.f32.xlu2 %v874_v23  ;;  %v892_v25 = vsel %vm891_vm6, %v874_v23, 0.0  ;;  %v782_v40 = vmul.f32 1.442695, %v781_v39 }
 0x570   :  { %893 = vadd.xlane.f32.xlu0 %v892_v25 }
 0x571   :  { %1146 = vpow2.f32 %v782_v40 }
 0x574   :  { %v875_v32 = vpop.f32.mrf.mxu2 }
 0x577   :  { %v1147_v49 = vpop.eup %1146 }
 0x587   :  { %791 = vperm.xlu2 %1113, %v789_v33  }
 0x5b0   :  { %637 = vadd.xlane.f32.xlu2 %v1145_v48 }
 0x5b8   :  { %784 = vadd.xlane.f32.xlu2 %v1147_v49 }
 0x5c0   :  { %599 = vadd.xlane.f32.xlu2 %v598_v50 }
 0x5c8   :  { %648 = vadd.xlane.f32.xlu2 %v647_v51 }
 0x5d0   :  { %v834_v63 = vpop.xlane.xlu1 %833 }
 0x5e2   :  { %v1661_v52 = vpop.xlane.xlu2 %877 }
 0x5e3   :  { %v879_v53 = vsub.f32 %v874_v23, %v1661_v52 }
 0x5e5   :  { %v880_v54 = vmul.f32 1.442695, %v879_v53  ;;  %v1185_v53 = vmov 64.0  }
 0x5e7   :  { %1148 = vpow2.f32 %v880_v54 }
 0x5e8   :  { %1150 = vlog2.f32 %v540_v35 }
 0x5e9   :  { %1152 = vlog2.f32 %v1633_v26 }
 0x5ea   :  { %v792_v55 = vpop.permute.xlu2 %791 }
 0x5eb   :  { %vm793_vm9 = vcmp.eq.s32.totalorder %v1400_v14, %v792_v55 }
 0x5ec   :  { %v794_v57 = vsel %vm793_vm9, %v1609_v56, 0.0  ;;  %v736_v56 = vpop.xlane.xlu0 %735 }
 0x5ed   :  { %v1149_v58 = vpop.eup %1148  ;;  %795 = vadd.xlane.f32.xlu2 %v794_v57 }
 0x5ee   :  { %882 = vadd.xlane.f32.xlu1 %v1149_v58  ;;  %v1151_v0 = vpop.eup %1150 }
 0x5ef   :  { %v1153_v46 = vpop.eup %1152  ;;  %v542_v8 = vmul.f32 0.6931472, %v1151_v0 }
 0x5f0   :  { %v591_v14 = vmul.f32 0.6931472, %v1153_v46 }
 0x5f1   :  { %v543_v17 = vadd.f32 %v542_v8, %v1558_v1 }
 0x5f2   :  { %v592_v18 = vadd.f32 %v591_v14, %v1582_v16 }
 0x5f3   :  { %v552_v20 = vsub.f32 %v543_v17, %v1618_v5 }
 0x5f4   :  { %v747_v43 = vpop.xlane.xlu0 %746 }
 0x5f6   :  { %697 = vadd.xlane.f32.xlu1 %v696_v10 }
 0x5fc   :  { %v894_v40 = vpop.xlane.xlu0 %893 }
 0x5fe   :  { %844 = vadd.xlane.f32.xlu1 %v843_v59 }
 0x623   :  { %v638_v60 = vpop.xlane.xlu2 %637 }
 0x624   :  { %1154 = vlog2.f32 %v638_v60 }
 0x625   :  { %1156 = vlog2.f32 %v687_v62 }
 0x626   :  { %1158 = vlog2.f32 %v736_v56 }
 0x62a   :  { %v1155_v3 = vpop.eup %1154 }
 0x62b   :  { %v785_v61 = vpop.xlane.xlu2 %784  ;;  %v1157_v9 = vpop.eup %1156  ;;  %v640_v11 = vmul.f32 0.6931472, %v1155_v3 }
 0x62c   :  { %v1159_v12 = vpop.eup %1158  ;;  %1160 = vlog2.f32 %v785_v61  ;;  %v689_v4 = vmul.f32 0.6931472, %v1157_v9 }
 0x62d   :  { %1162 = vlog2.f32 %v834_v63  ;;  %v738_v6 = vmul.f32 0.6931472, %v1159_v12  ;;  %v641_v21 = vadd.f32 %v640_v11, %v1635_v24 }
 0x62e   :  { %v690_v1 = vadd.f32 %v689_v4, %v1620_v7 }
 0x62f   :  { %v739_v29 = vadd.f32 %v738_v6, %v1637_v27 }
 0x631   :  { %v748_v45 = vsub.f32 %v739_v29, %v747_v43 }
 0x632   :  { %v1161_v44 = vpop.eup %1160 }
 0x633   :  { %v600_v2 = vpop.xlane.xlu2 %599  ;;  %v1163_v28 = vpop.eup %1162  ;;  %v787_v16 = vmul.f32 0.6931472, %v1161_v44 }
 0x634   :  { %v601_v13 = vsub.f32 %v592_v18, %v600_v2  ;;  %v836_v22 = vmul.f32 0.6931472, %v1163_v28 }
 0x635   :  { %v788_v5 = vadd.f32 %v787_v16, %v1652_v38 }
 0x636   :  { %v602_v30 = vadd.f32 %v601_v13, %v552_v20  ;;  %v837_v47 = vadd.f32 %v836_v22, %v1641_v37 }
 0x63b   :  { %v649_v19 = vpop.xlane.xlu2 %648 }
 0x63c   :  { %v650_v26 = vsub.f32 %v641_v21, %v649_v19 }
 0x63e   :  { %v651_v41 = vadd.f32 %v650_v26, %v602_v30 }
 0x660   :  { %v796_v25 = vpop.xlane.xlu2 %795 }
 0x661   :  { %v883_v15 = vpop.xlane.xlu1 %882  ;;  %v797_v33 = vsub.f32 %v788_v5, %v796_v25 }
 0x662   :  { %1164 = vlog2.f32 %v883_v15 }
 0x663   :  { %1166 = vrcp.f32 %v1185_v53 }
 0x668   :  { %v1165_v34 = vpop.eup %1164 }
 0x669   :  { %v698_v35 = vpop.xlane.xlu1 %697  ;;  %v885_v23 = vmul.f32 0.6931472, %v1165_v34  ;;  %v1167_v54 = vpop.eup %1166 }
 0x66a   :  { %v699_v42 = vsub.f32 %v690_v1, %v698_v35  ;;  %v909_v38 = vmul.f32 64.0, %v1167_v54  ;;  %vm913_vm13 = vweird.f32 %v1167_v54 }
 0x66b   :  { %v886_v27 = vadd.f32 %v885_v23, %v1661_v52 }
 0x66c   :  { %v700_v24 = vadd.f32 %v699_v42, %v651_v41  ;;  %v910_v55 = vsub.f32 1.0, %v909_v38 }
 0x66d   :  { %v895_v49 = vsub.f32 %v886_v27, %v894_v40 }
 0x66e   :  { %v749_v32 = vadd.f32 %v748_v45, %v700_v24  ;;  %v911_v10 = vmul.f32 %v1167_v54, %v910_v55 }
 0x670   :  { %v798_v36 = vadd.f32 %v797_v33, %v749_v32  ;;  %v912_v59 = vadd.f32 %v1167_v54, %v911_v10 }
 0x671   :  { %v845_v7 = vpop.xlane.xlu1 %844 }
 0x672   :  { %v846_v39 = vsub.f32 %v837_v47, %v845_v7  ;;  %v914_v62 = vsel %vm913_vm13, %v1167_v54, %v912_v59 }
 0x674   :  { %v847_v48 = vadd.f32 %v846_v39, %v798_v36 }
 0x676   :  { %v896_v50 = vadd.f32 %v895_v49, %v847_v48 }
 0x678   :  { %v898_v51 = vsel %vm897_vm12, %v896_v50, 0.0 }
 0x679   :  { %899 = vadd.xlane.f32.xlu2 %v898_v51 }
 0x6ec   :  { %v900_v57 = vpop.xlane.xlu2 %899 }
 0x6ed   :  { %v901_v58 = vrot.slane %v900_v57, 4 }
 0x6ef   :  { %v902_v52 = vadd.f32 %v901_v58, %v900_v57 }
 0x6f1   :  { %v903_v37 = vrot.slane %v902_v52, 2 }
 0x6f3   :  { %v904_v31 = vadd.f32 %v903_v37, %v902_v52 }
 0x6f5   :  { %v905_v60 = vrot.slane %v904_v31, 1 }
 0x6f7   :  { %v906_v61 = vadd.f32 %v905_v60, %v904_v31 }
 0x6f9   :  { %1102 = vpush %v906_v61 }
 0x6fa   :  { %1104 = vpush %v914_v62 }
 0x72a   :  { %s1103_s29 = spop %1102 }
 0x72b   :  { %s1105_s30 = spop %1104 }
 0x72c   :  { %s916_s10 = smul.f32 %s1105_s30, %s1103_s29 }
 0x72e   :  { %918 = sst [smem:[#allocation2]] %s916_s10 }
 0x72f   :  { %927 = dma.smem_to_hbm %s1186_s4, 16, %s925_s28, [#allocation3]  }
 0x730   :  { %1180 = dma.done.wait [#allocation3], 16  }
 0x731   :  { %1181 = vsyncadd [#allocation3], 4294967280 }
 0x732   :  { %932 = sfence }
 0x733   :  { %933 = vsyncpa [#allocation3], 1 }

</bundles_post_ra>
